<compile_context>
chip_gen: v7x
topology: tpu7x:2x2x1
jax: 0.10.0
libtpu: 0.0.40
codegen_flags: <defaults>
</compile_context>

<pallas_src>
from functools import partial

import jax
import jax.numpy as jnp
from jax.experimental import pallas as pl
from jax.experimental.pallas import tpu as pltpu

LANE = 128     # lane width: only the final output feature dim is padded to this
SUBLANE = 8    # sublane granularity for the batch (second-minor) dim


def _round_up(n, m):
    return (n + m - 1) // m * m


def netb_kernel(x_ref, w1_ref, b1_ref, w2_ref, b2_ref, w3_ref, b3_ref, o_ref):
    # x arrives f32 (cheap DMA, no wrapper cast op); cast to bf16 for the MXU.
    x = x_ref[...].astype(jnp.bfloat16)
    h1 = jnp.dot(x, w1_ref[...], preferred_element_type=jnp.float32)
    h1 = jnp.maximum(h1 + b1_ref[...], 0.0)
    h2 = jnp.dot(h1.astype(jnp.bfloat16), w2_ref[...],
                 preferred_element_type=jnp.float32)
    h2 = jnp.maximum(h2 + b2_ref[...], 0.0)
    out = jnp.dot(h2.astype(jnp.bfloat16), w3_ref[...],
                  preferred_element_type=jnp.float32)
    o_ref[...] = (out + b3_ref[...]).astype(o_ref.dtype)   # bf16, lane-dense store


def prepare_netb_params(w1, b1, w2, b2, w3, b3):
    """One-time parameter prep (hoisted out of the per-call path).

    Weights -> bf16; only the last layer's output dim is zero-padded to a
    multiple of 128 lanes (keeps the kernel's output store unmasked).
    Biases stay f32 (tiny; bias-add happens in f32 inside the kernel).
    """
    out_dim = w3.shape[1]
    out_p = _round_up(out_dim, LANE)
    w3_p = jnp.pad(w3, ((0, 0), (0, out_p - out_dim)))
    b3_p = jnp.pad(b3, ((0, 0), (0, out_p - out_dim)))
    return (w1.astype(jnp.bfloat16), b1,
            w2.astype(jnp.bfloat16), b2,
            w3_p.astype(jnp.bfloat16), b3_p)


@partial(jax.jit, static_argnames=("out_dim", "block_m"))
def netb_forward(x, params, *, out_dim, block_m=1024):
    w1, b1, w2, b2, w3, b3 = params
    batch, in_dim = x.shape
    hid1 = w1.shape[1]
    hid2 = w2.shape[1]
    out_p = w3.shape[1]          # already lane-padded in prepare_netb_params

    # Batch tiling: whole batch in one grid step when small (grid=(1,) => no
    # per-step pipeline overhead on single-TC chips); 1024-row tiles otherwise.
    bm = min(block_m, _round_up(batch, SUBLANE))
    batch_p = _round_up(batch, bm)
    grid = (batch_p // bm,)

    x_p = x if batch_p == batch else jnp.pad(x, ((0, batch_p - batch), (0, 0)))

    flops = 2 * batch_p * (in_dim * hid1 + hid1 * hid2 + hid2 * out_p)
    bytes_accessed = (batch_p * in_dim * 4                      # x (f32)
                      + (in_dim * hid1 + hid1 * hid2 + hid2 * out_p) * 2  # weights bf16
                      + (hid1 + hid2 + out_p) * 4               # biases f32
                      + batch_p * out_p * 2)                    # output bf16

    out_padded = pl.pallas_call(
        netb_kernel,
        out_shape=jax.ShapeDtypeStruct((batch_p, out_p), jnp.bfloat16),
        grid_spec=pltpu.PrefetchScalarGridSpec(
            num_scalar_prefetch=0,
            grid=grid,
            in_specs=[
                pl.BlockSpec((bm, in_dim), lambda i: (i, 0)),   # x: streamed per step
                pl.BlockSpec((in_dim, hid1), lambda i: (0, 0)), # params: VMEM-resident
                pl.BlockSpec((1, hid1), lambda i: (0, 0)),
                pl.BlockSpec((hid1, hid2), lambda i: (0, 0)),
                pl.BlockSpec((1, hid2), lambda i: (0, 0)),
                pl.BlockSpec((hid2, out_p), lambda i: (0, 0)),
                pl.BlockSpec((1, out_p), lambda i: (0, 0)),
            ],
            out_specs=pl.BlockSpec((bm, out_p), lambda i: (i, 0)),
        ),
        compiler_params=pltpu.CompilerParams(
            dimension_semantics=("parallel",),  # batch tiles may shard across TCs (v7x)
        ),
        cost_estimate=pl.CostEstimate(
            flops=flops, transcendentals=0, bytes_accessed=bytes_accessed),
    )(x_p, w1, b1, w2, b2, w3, b3)

    # Slice away batch / lane padding; return f32 like the reference module.
    return out_padded[:batch, :out_dim].astype(jnp.float32)


def init_linear(key, fan_in, fan_out):
    # Deterministic init mimicking nn.Linear default: U(-1/sqrt(fan_in), 1/sqrt(fan_in)).
    kw, kb = jax.random.split(key)
    bound = 1.0 / jnp.sqrt(jnp.float32(fan_in))
    w = jax.random.uniform(kw, (fan_in, fan_out), jnp.float32, -bound, bound)
    b = jax.random.uniform(kb, (1, fan_out), jnp.float32, -bound, bound)
    return w, b


if __name__ == "__main__":
    # Dims consistent with the module: in=32, hid1=64, hid2=32, out=16.
    # batch=512 fits a single grid step (bm=512, grid=(1,)) at these sizes.
    batch, in_dim, hid1_dim, hid2_dim, out_dim = 512, 32, 64, 32, 16

    key = jax.random.PRNGKey(0)
    kx, k1, k2, k3 = jax.random.split(key, 4)

    x = jax.random.normal(kx, (batch, in_dim), jnp.float32)
    w1, b1 = init_linear(k1, in_dim, hid1_dim)
    w2, b2 = init_linear(k2, hid1_dim, hid2_dim)
    w3, b3 = init_linear(k3, hid2_dim, out_dim)

    # One-time parameter prep (padding + bf16 casts hoisted out of the call path).
    params = prepare_netb_params(w1, b1, w2, b2, w3, b3)
    params = jax.tree_util.tree_map(jax.block_until_ready, params)

    out = jax.block_until_ready(netb_forward(x, params, out_dim=out_dim))

    # Pure-JAX f32 reference (kernel uses bf16 matmul operands / bf16 output
    # store -> loose tolerance).
    ref = jnp.maximum(x @ w1 + b1, 0.0)
    ref = jnp.maximum(ref @ w2 + b2, 0.0)
    ref = ref @ w3 + b3

    assert out.shape == (batch, out_dim)
    assert jnp.allclose(out, ref, atol=5e-2, rtol=5e-2), float(jnp.max(jnp.abs(out - ref)))

    print("KERNEL_OK")
</pallas_src>

<mosaic_0001>
module attributes {stable_mosaic.version = 11 : i64} {
  func.func @netb_kernel(%arg0: i32, %arg1: memref<512x32xf32, #tpu.memory_space<vmem>>, %arg2: memref<32x64xbf16, #tpu.memory_space<vmem>>, %arg3: memref<1x64xf32, #tpu.memory_space<vmem>>, %arg4: memref<64x32xbf16, #tpu.memory_space<vmem>>, %arg5: memref<1x32xf32, #tpu.memory_space<vmem>>, %arg6: memref<32x128xbf16, #tpu.memory_space<vmem>>, %arg7: memref<1x128xf32, #tpu.memory_space<vmem>>, %arg8: memref<512x128xbf16, #tpu.memory_space<vmem>>) attributes {dimension_semantics = [#tpu.dimension_semantics<parallel>], iteration_bounds = array<i64: 1>, scalar_prefetch = 0 : i64, scratch_operands = 0 : i64, tpu.core_type = #tpu.core_type<tc>, window_params = [{transform_indices = @transform_0, window_bounds = array<i64: 512, 32>}, {pipeline_mode = #tpu.pipeline_mode<synchronous>, transform_indices = @transform_1, window_bounds = array<i64: 32, 64>}, {pipeline_mode = #tpu.pipeline_mode<synchronous>, transform_indices = @transform_2, window_bounds = array<i64: 1, 64>}, {pipeline_mode = #tpu.pipeline_mode<synchronous>, transform_indices = @transform_3, window_bounds = array<i64: 64, 32>}, {pipeline_mode = #tpu.pipeline_mode<synchronous>, transform_indices = @transform_4, window_bounds = array<i64: 1, 32>}, {pipeline_mode = #tpu.pipeline_mode<synchronous>, transform_indices = @transform_5, window_bounds = array<i64: 32, 128>}, {pipeline_mode = #tpu.pipeline_mode<synchronous>, transform_indices = @transform_6, window_bounds = array<i64: 1, 128>}, {transform_indices = @transform_7, window_bounds = array<i64: 512, 128>}]} {
    %c0 = arith.constant 0 : index
    %c0_0 = arith.constant 0 : index
    %0 = vector.load %arg1[%c0, %c0_0] : memref<512x32xf32, #tpu.memory_space<vmem>>, vector<512x32xf32>
    %1 = arith.truncf %0 : vector<512x32xf32> to vector<512x32xbf16>
    %c0_1 = arith.constant 0 : index
    %c0_2 = arith.constant 0 : index
    %2 = vector.load %arg2[%c0_1, %c0_2] : memref<32x64xbf16, #tpu.memory_space<vmem>>, vector<32x64xbf16>
    %cst = arith.constant dense<0.000000e+00> : vector<512x64xf32>
    %3 = tpu.matmul %1, %2, %cst {dimension_numbers = #tpu.dot_dimension_numbers<[1], [0], [0], [1], [0, 0, 1, 1], [], []>} : vector<512x32xbf16>, vector<32x64xbf16>, vector<512x64xf32> -> vector<512x64xf32>
    %c0_3 = arith.constant 0 : index
    %c0_4 = arith.constant 0 : index
    %4 = vector.load %arg3[%c0_3, %c0_4] : memref<1x64xf32, #tpu.memory_space<vmem>>, vector<1x64xf32>
    %5 = vector.broadcast %4 : vector<1x64xf32> to vector<512x64xf32>
    %6 = arith.addf %3, %5 : vector<512x64xf32>
    %cst_5 = arith.constant 0.000000e+00 : f32
    %7 = vector.broadcast %cst_5 : f32 to vector<512x64xf32>
    %8 = arith.maximumf %6, %7 : vector<512x64xf32>
    %9 = arith.truncf %8 : vector<512x64xf32> to vector<512x64xbf16>
    %c0_6 = arith.constant 0 : index
    %c0_7 = arith.constant 0 : index
    %10 = vector.load %arg4[%c0_6, %c0_7] : memref<64x32xbf16, #tpu.memory_space<vmem>>, vector<64x32xbf16>
    %cst_8 = arith.constant dense<0.000000e+00> : vector<512x32xf32>
    %11 = tpu.matmul %9, %10, %cst_8 {dimension_numbers = #tpu.dot_dimension_numbers<[1], [0], [0], [1], [0, 0, 1, 1], [], []>} : vector<512x64xbf16>, vector<64x32xbf16>, vector<512x32xf32> -> vector<512x32xf32>
    %c0_9 = arith.constant 0 : index
    %c0_10 = arith.constant 0 : index
    %12 = vector.load %arg5[%c0_9, %c0_10] : memref<1x32xf32, #tpu.memory_space<vmem>>, vector<1x32xf32>
    %13 = vector.broadcast %12 : vector<1x32xf32> to vector<512x32xf32>
    %14 = arith.addf %11, %13 : vector<512x32xf32>
    %cst_11 = arith.constant 0.000000e+00 : f32
    %15 = vector.broadcast %cst_11 : f32 to vector<512x32xf32>
    %16 = arith.maximumf %14, %15 : vector<512x32xf32>
    %17 = arith.truncf %16 : vector<512x32xf32> to vector<512x32xbf16>
    %c0_12 = arith.constant 0 : index
    %c0_13 = arith.constant 0 : index
    %18 = vector.load %arg6[%c0_12, %c0_13] : memref<32x128xbf16, #tpu.memory_space<vmem>>, vector<32x128xbf16>
    %cst_14 = arith.constant dense<0.000000e+00> : vector<512x128xf32>
    %19 = tpu.matmul %17, %18, %cst_14 {dimension_numbers = #tpu.dot_dimension_numbers<[1], [0], [0], [1], [0, 0, 1, 1], [], []>} : vector<512x32xbf16>, vector<32x128xbf16>, vector<512x128xf32> -> vector<512x128xf32>
    %c0_15 = arith.constant 0 : index
    %c0_16 = arith.constant 0 : index
    %20 = vector.load %arg7[%c0_15, %c0_16] : memref<1x128xf32, #tpu.memory_space<vmem>>, vector<1x128xf32>
    %21 = vector.broadcast %20 : vector<1x128xf32> to vector<512x128xf32>
    %22 = arith.addf %19, %21 : vector<512x128xf32>
    %23 = arith.truncf %22 : vector<512x128xf32> to vector<512x128xbf16>
    %c0_17 = arith.constant 0 : index
    %c0_18 = arith.constant 0 : index
    %24 = vector.load %arg8[%c0_17, %c0_18] : memref<512x128xbf16, #tpu.memory_space<vmem>>, vector<512x128xbf16>
    tpu.vector_store %arg8[%c0_17, %c0_18], %23 {strides = array<i32>} : memref<512x128xbf16, #tpu.memory_space<vmem>>, vector<512x128xbf16>,
    return
  }
  func.func @transform_0(%arg0: i32) -> (i32, i32) {
    %c0_i32 = arith.constant 0 : i32
    %c0_i32_0 = arith.constant 0 : i32
    return %arg0, %c0_i32 : i32, i32
  }
  func.func @transform_1(%arg0: i32) -> (i32, i32) {
    %c0_i32 = arith.constant 0 : i32
    %c0_i32_0 = arith.constant 0 : i32
    %c0_i32_1 = arith.constant 0 : i32
    return %c0_i32, %c0_i32_0 : i32, i32
  }
  func.func @transform_2(%arg0: i32) -> (i32, i32) {
    %c0_i32 = arith.constant 0 : i32
    %c0_i32_0 = arith.constant 0 : i32
    %c0_i32_1 = arith.constant 0 : i32
    return %c0_i32, %c0_i32_0 : i32, i32
  }
  func.func @transform_3(%arg0: i32) -> (i32, i32) {
    %c0_i32 = arith.constant 0 : i32
    %c0_i32_0 = arith.constant 0 : i32
    %c0_i32_1 = arith.constant 0 : i32
    return %c0_i32, %c0_i32_0 : i32, i32
  }
  func.func @transform_4(%arg0: i32) -> (i32, i32) {
    %c0_i32 = arith.constant 0 : i32
    %c0_i32_0 = arith.constant 0 : i32
    %c0_i32_1 = arith.constant 0 : i32
    return %c0_i32, %c0_i32_0 : i32, i32
  }
  func.func @transform_5(%arg0: i32) -> (i32, i32) {
    %c0_i32 = arith.constant 0 : i32
    %c0_i32_0 = arith.constant 0 : i32
    %c0_i32_1 = arith.constant 0 : i32
    return %c0_i32, %c0_i32_0 : i32, i32
  }
  func.func @transform_6(%arg0: i32) -> (i32, i32) {
    %c0_i32 = arith.constant 0 : i32
    %c0_i32_0 = arith.constant 0 : i32
    %c0_i32_1 = arith.constant 0 : i32
    return %c0_i32, %c0_i32_0 : i32, i32
  }
  func.func @transform_7(%arg0: i32) -> (i32, i32) {
    %c0_i32 = arith.constant 0 : i32
    %c0_i32_0 = arith.constant 0 : i32
    return %arg0, %c0_i32 : i32, i32
  }
}

</mosaic_0001>

<bundles_post_ra>
// kernel: netb_forward.1
= control target key start
LH: loop header
LB: loop body
LE: loop exit
PB: predicated region body
PF: predicated region fallthrough
CT: control target
= control target key end

     0   :  { %vm146_vm0 = vcmask 261120   ;;  %vm667_vm1 = vcmask 523264   ;;  %s3316_s1 = inlined_call_operand.vmem [shape: bf16[32,64], index: 1, kind: input, shape index: {}]   ;;  %s3317_s0 = inlined_call_operand.vmem [shape: f32[512,32], index: 0, kind: input, shape index: {}]   ;;  %s3318_s3 = inlined_call_operand.vmem [shape: bf16[64,32], index: 3, kind: input, shape index: {}]   ;;  %s3319_s2 = inlined_call_operand.vmem [shape: f32[1,64], index: 2, kind: input, shape index: {}]   ;;  %s3320_s5 = inlined_call_operand.vmem [shape: bf16[32,128], index: 5, kind: input, shape index: {}]   ;;  %s3321_s4 = inlined_call_operand.vmem [shape: f32[1,32], index: 4, kind: input, shape index: {}]   ;;  %s3322_s6 = inlined_call_operand.vmem [shape: f32[1,128], index: 6, kind: input, shape index: {}]   ;;  %s3323_s7 = inlined_call_operand.vmem [shape: bf16[512,128], index: 7, kind: output, shape index: {}]  }
   0x1   :  { %v2623_v0 = vld [vmem:[%s3316_s1] sm:$0xff]   ;;  %v2624_v1 = vld [vmem:[%s3316_s1 + $0x8] sm:$0xff]   ;;  %v29_v5 = vld [vmem:[%s3317_s0 + $0x10] sm:$0xff] }
   0x2   :  { %2411 = vmatprep.subr.bf16.mxu0 %v2623_v0  ;;  %v27_v2 = vld [vmem:[%s3317_s0] sm:$0xff]  ;;  %v28_v3 = vld [vmem:[%s3317_s0 + $0x8] sm:$0xff]  ;;  %2619 = vmatprep.subr.bf16.mxu1 %v2623_v0  ;;  %v30_v6 = vld [vmem:[%s3317_s0 + $0x18] sm:$0xff] }
   0x3   :  { %2412 = vmatpush3.bf16.msra.mxu0 %v2623_v0  ;;  %v91_v4 = vpack.c.bf16 %v28_v3, %v27_v2  ;;  %2621 = vmatpush3.bf16.msra.mxu1 %v2623_v0  ;;  %v31_v7 = vld [vmem:[%s3317_s0 + $0x20] sm:$0xff]  ;;  %v32_v8 = vld [vmem:[%s3317_s0 + $0x28] sm:$0xff]  ;;  %v92_v9 = vpack.c.bf16 %v30_v6, %v29_v5  ;;  %v33_v11 = vld [vmem:[%s3317_s0 + $0x30] sm:$0xff] }
   0x4   :  { %2413 = vmatprep.subr.bf16.mxu0 %v2624_v1  ;;  %2620 = vmatprep.subr.bf16.mxu1 %v2624_v1  ;;  %v93_v10 = vpack.c.bf16 %v32_v8, %v31_v7  ;;  %v34_v12 = vld [vmem:[%s3317_s0 + $0x38] sm:$0xff]  ;;  %v35_v13 = vld [vmem:[%s3317_s0 + $0x40] sm:$0xff]  ;;  %v36_v14 = vld [vmem:[%s3317_s0 + $0x48] sm:$0xff] }
   0x5   :  { %2415 = vmatprep.mubr.msk.bf16.mxu0 %vm146_vm0, %v91_v4  ;;  %v59_v15 = vld [vmem:[%s3317_s0 + $0x100] sm:$0xff]  ;;  %v60_v16 = vld [vmem:[%s3317_s0 + $0x108] sm:$0xff]  ;;  %v61_v17 = vld [vmem:[%s3317_s0 + $0x110] sm:$0xff]  ;;  %v94_v19 = vpack.c.bf16 %v34_v12, %v33_v11  ;;  %v95_v24 = vpack.c.bf16 %v36_v14, %v35_v13 }
   0x6   :  { %v62_v18 = vld [vmem:[%s3317_s0 + $0x118] sm:$0xff]  ;;  %v107_v20 = vpack.c.bf16 %v60_v16, %v59_v15  ;;  %v63_v22 = vld [vmem:[%s3317_s0 + $0x120] sm:$0xff]  ;;  %v64_v23 = vld [vmem:[%s3317_s0 + $0x128] sm:$0xff] }
   0x7   :  { %2414 = vmatpush3.bf16.msra.mxu0 %v2624_v1  ;;  %2622 = vmatpush3.bf16.msra.mxu1 %v2624_v1  ;;  %v108_v21 = vpack.c.bf16 %v62_v18, %v61_v17  ;;  %v109_v25 = vpack.c.bf16 %v64_v23, %v63_v22  ;;  %v37_v26 = vld [vmem:[%s3317_s0 + $0x50] sm:$0xff]  ;;  %v66_v28 = vld [vmem:[%s3317_s0 + $0x138] sm:$0xff]  ;;  %v67_v30 = vld [vmem:[%s3317_s0 + $0x140] sm:$0xff] }
   0x8   :  { %2447 = vmatprep.mubr.msk.bf16.mxu1 %vm146_vm0, %v107_v20  ;;  %v65_v27 = vld [vmem:[%s3317_s0 + $0x130] sm:$0xff]  ;;  %v38_v29 = vld [vmem:[%s3317_s0 + $0x58] sm:$0xff]  ;;  %v68_v31 = vld [vmem:[%s3317_s0 + $0x148] sm:$0xff] }
   0x9   :  { %v39_v32 = vld [vmem:[%s3317_s0 + $0x60] sm:$0xff]  ;;  %v40_v33 = vld [vmem:[%s3317_s0 + $0x68] sm:$0xff]  ;;  %v110_v34 = vpack.c.bf16 %v66_v28, %v65_v27  ;;  %v96_v35 = vpack.c.bf16 %v38_v29, %v37_v26  ;;  %v111_v36 = vpack.c.bf16 %v68_v31, %v67_v30  ;;  %v69_v38 = vld [vmem:[%s3317_s0 + $0x150] sm:$0xff] }
   0xa   :  { %2416 = vmatmul.mubr.msk.bf16.vlgmr.msra.gmra.mrb[0].mxu0 %vm146_vm0, %v92_v9  ;;  %2448 = vmatmul.mubr.msk.bf16.vlgmr.msra.gmra.mrb[0].mxu1 %vm146_vm0, %v108_v21  ;;  %v97_v37 = vpack.c.bf16 %v40_v33, %v39_v32  ;;  %v2625_v39 = vld [vmem:[%s3318_s3] sm:$0xff]   ;;  %v41_v40 = vld [vmem:[%s3317_s0 + $0x70] sm:$0xff]  ;;  %v2626_v41 = vld [vmem:[%s3318_s3 + $0x8] sm:$0xff]  }
   0xb   :  { %2419 = vmatprep.mubr.msk.bf16.mxu0 %vm146_vm0, %v93_v10  ;;  %2451 = vmatprep.mubr.msk.bf16.mxu1 %vm146_vm0, %v109_v25  ;;  %v70_v42 = vld [vmem:[%s3317_s0 + $0x158] sm:$0xff]  ;;  %v71_v44 = vld [vmem:[%s3317_s0 + $0x160] sm:$0xff]  ;;  %v72_v45 = vld [vmem:[%s3317_s0 + $0x168] sm:$0xff] }
   0xc   :  { %v42_v43 = vld [vmem:[%s3317_s0 + $0x78] sm:$0xff]  ;;  %2479 = vmatprep.subr.bf16.mxu1 %v2625_v39  ;;  %v43_v46 = vld [vmem:[%s3317_s0 + $0x80] sm:$0xff]  ;;  %v44_v47 = vld [vmem:[%s3317_s0 + $0x88] sm:$0xff]  ;;  %v112_v48 = vpack.c.bf16 %v70_v42, %v69_v38  ;;  %v113_v51 = vpack.c.bf16 %v72_v45, %v71_v44 }
   0xd   :  { %2480 = vmatpush3.bf16.msra.mxu1 %v2625_v39  ;;  %v2627_v49 = vld [vmem:[%s3318_s3 + $0x10] sm:$0xff]   ;;  %v98_v50 = vpack.c.bf16 %v42_v43, %v41_v40  ;;  %v99_v52 = vpack.c.bf16 %v44_v47, %v43_v46  ;;  %v2628_v53 = vld [vmem:[%s3318_s3 + $0x18] sm:$0xff]   ;;  %v75_v58 = vld [vmem:[%s3317_s0 + $0x180] sm:$0xff] }
   0xe   :  { %2481 = vmatprep.subr.bf16.mxu1 %v2626_v41  ;;  %v45_v54 = vld [vmem:[%s3317_s0 + $0x90] sm:$0xff]  ;;  %v74_v56 = vld [vmem:[%s3317_s0 + $0x178] sm:$0xff]  ;;  %v76_v59 = vld [vmem:[%s3317_s0 + $0x188] sm:$0xff] }
   0xf   :  { %v73_v55 = vld [vmem:[%s3317_s0 + $0x170] sm:$0xff]  ;;  %v46_v57 = vld [vmem:[%s3317_s0 + $0x98] sm:$0xff]  ;;  %v47_v60 = vld [vmem:[%s3317_s0 + $0xa0] sm:$0xff]  ;;  %v115_v0 = vpack.c.bf16 %v76_v59, %v75_v58 }
  0x10   :  { %v48_v61 = vld [vmem:[%s3317_s0 + $0xa8] sm:$0xff]  ;;  %v114_v62 = vpack.c.bf16 %v74_v56, %v73_v55  ;;  %v100_v63 = vpack.c.bf16 %v46_v57, %v45_v54  ;;  %v49_v2 = vld [vmem:[%s3317_s0 + $0xb0] sm:$0xff]  ;;  %v78_v4 = vld [vmem:[%s3317_s0 + $0x198] sm:$0xff] }
  0x11   :  { %2482 = vmatpush3.bf16.msra.mxu1 %v2626_v41  ;;  %v101_v1 = vpack.c.bf16 %v48_v61, %v47_v60  ;;  %v77_v3 = vld [vmem:[%s3317_s0 + $0x190] sm:$0xff]  ;;  %v50_v5 = vld [vmem:[%s3317_s0 + $0xb8] sm:$0xff]  ;;  %v79_v6 = vld [vmem:[%s3317_s0 + $0x1a0] sm:$0xff] }
  0x12   :  { %2420 = vmatmul.mubr.msk.bf16.gmra.mrb[4].mxu0 %vm146_vm0, %v94_v19  ;;  %2452 = vmatmul.mubr.msk.bf16.gmra.mrb[4].mxu1 %vm146_vm0, %v110_v34  ;;  %v80_v7 = vld [vmem:[%s3317_s0 + $0x1a8] sm:$0xff]  ;;  %v51_v8 = vld [vmem:[%s3317_s0 + $0xc0] sm:$0xff]  ;;  %v116_v10 = vpack.c.bf16 %v78_v4, %v77_v3  ;;  %v102_v11 = vpack.c.bf16 %v50_v5, %v49_v2  ;;  %v53_v14 = vld [vmem:[%s3317_s0 + $0xd0] sm:$0xff] }
  0x13   :  { %2423 = vmatprep.mubr.msk.bf16.mxu0 %vm146_vm0, %v95_v24  ;;  %2455 = vmatprep.mubr.msk.bf16.mxu1 %vm146_vm0, %v111_v36  ;;  %v52_v9 = vld [vmem:[%s3317_s0 + $0xc8] sm:$0xff]  ;;  %v117_v12 = vpack.c.bf16 %v80_v7, %v79_v6  ;;  %v81_v15 = vld [vmem:[%s3317_s0 + $0x1b0] sm:$0xff]  ;;  %v82_v16 = vld [vmem:[%s3317_s0 + $0x1b8] sm:$0xff] }
  0x14   :  { %2483 = vmatprep.subr.bf16.mxu1 %v2627_v49  ;;  %v103_v13 = vpack.c.bf16 %v52_v9, %v51_v8  ;;  %v54_v17 = vld [vmem:[%s3317_s0 + $0xd8] sm:$0xff]  ;;  %v83_v18 = vld [vmem:[%s3317_s0 + $0x1c0] sm:$0xff]  ;;  %v84_v19 = vld [vmem:[%s3317_s0 + $0x1c8] sm:$0xff]  ;;  %v118_v22 = vpack.c.bf16 %v82_v16, %v81_v15 }
  0x15   :  { %2484 = vmatpush3.bf16.msra.mxu1 %v2627_v49  ;;  %v55_v20 = vld [vmem:[%s3317_s0 + $0xe0] sm:$0xff]  ;;  %v56_v21 = vld [vmem:[%s3317_s0 + $0xe8] sm:$0xff]  ;;  %v104_v23 = vpack.c.bf16 %v54_v17, %v53_v14  ;;  %v119_v24 = vpack.c.bf16 %v84_v19, %v83_v18  ;;  %v57_v26 = vld [vmem:[%s3317_s0 + $0xf0] sm:$0xff] }
  0x16   :  { %2485 = vmatprep.subr.bf16.mxu1 %v2628_v53  ;;  %v105_v25 = vpack.c.bf16 %v56_v21, %v55_v20  ;;  %v85_v27 = vld [vmem:[%s3317_s0 + $0x1d0] sm:$0xff]  ;;  %v86_v28 = vld [vmem:[%s3317_s0 + $0x1d8] sm:$0xff]  ;;  %v87_v30 = vld [vmem:[%s3317_s0 + $0x1e0] sm:$0xff] }
  0x17   :  { %v58_v29 = vld [vmem:[%s3317_s0 + $0xf8] sm:$0xff]  ;;  %v88_v31 = vld [vmem:[%s3317_s0 + $0x1e8] sm:$0xff]  ;;  %v120_v32 = vpack.c.bf16 %v86_v28, %v85_v27  ;;  %v2916_v38 = vld [vmem:[%s3319_s2] ss:$0 sm:$0xff] }
  0x18   :  { %v106_v33 = vpack.c.bf16 %v58_v29, %v57_v26  ;;  %v121_v34 = vpack.c.bf16 %v88_v31, %v87_v30  ;;  %v90_v36 = vld [vmem:[%s3317_s0 + $0x1f8] sm:$0xff] }
  0x19   :  { %2486 = vmatpush3.bf16.msra.mxu1 %v2628_v53 }
  0x1a   :  { %2424 = vmatmul.mubr.msk.bf16.gmra.mrb[8].mxu0 %vm146_vm0, %v96_v35  ;;  %2456 = vmatmul.mubr.msk.bf16.gmra.mrb[8].mxu1 %vm146_vm0, %v112_v48  ;;  %v89_v35 = vld [vmem:[%s3317_s0 + $0x1f0] sm:$0xff]  ;;  %v2629_v48 = vld [vmem:[%s3320_s5] sm:$0xff]  }
  0x1b   :  { %2427 = vmatprep.mubr.msk.bf16.mxu0 %vm146_vm0, %v97_v37  ;;  %2459 = vmatprep.mubr.msk.bf16.mxu1 %vm146_vm0, %v113_v51  ;;  %v122_v37 = vpack.c.bf16 %v90_v36, %v89_v35 }
  0x1c   :  { %2551 = vmatprep.subr.bf16.mxu0 %v2629_v48 }
  0x1d   :  { %2552 = vmatpush3.bf16.msra.mxu0 %v2629_v48 }
  0x22   :  { %2428 = vmatmul.mubr.msk.bf16.gmra.mrb[12].mxu0 %vm146_vm0, %v98_v50  ;;  %2460 = vmatmul.mubr.msk.bf16.gmra.mrb[12].mxu1 %vm146_vm0, %v114_v62  ;;  %v2630_v50 = vld [vmem:[%s3320_s5 + $0x8] sm:$0xff]  }
  0x23   :  { %2431 = vmatprep.mubr.msk.bf16.mxu0 %vm146_vm0, %v99_v52  ;;  %2463 = vmatprep.mubr.msk.bf16.mxu1 %vm146_vm0, %v115_v0 }
  0x24   :  { %2553 = vmatprep.subr.bf16.mxu0 %v2630_v50 }
  0x25   :  { %2554 = vmatpush3.bf16.msra.mxu0 %v2630_v50 }
  0x2a   :  { %2432 = vmatmul.mubr.msk.bf16.gmra.mrb[16].mxu0 %vm146_vm0, %v100_v63  ;;  %2464 = vmatmul.mubr.msk.bf16.gmra.mrb[16].mxu1 %vm146_vm0, %v116_v10 }
  0x2b   :  { %2435 = vmatprep.mubr.msk.bf16.mxu0 %vm146_vm0, %v101_v1  ;;  %2467 = vmatprep.mubr.msk.bf16.mxu1 %vm146_vm0, %v117_v12 }
  0x32   :  { %2436 = vmatmul.mubr.msk.bf16.gmra.mrb[20].mxu0 %vm146_vm0, %v102_v11  ;;  %2468 = vmatmul.mubr.msk.bf16.gmra.mrb[20].mxu1 %vm146_vm0, %v118_v22 }
  0x33   :  { %2439 = vmatprep.mubr.msk.bf16.mxu0 %vm146_vm0, %v103_v13  ;;  %2471 = vmatprep.mubr.msk.bf16.mxu1 %vm146_vm0, %v119_v24 }
  0x3a   :  { %2440 = vmatmul.mubr.msk.bf16.gmra.mrb[24].mxu0 %vm146_vm0, %v104_v23  ;;  %2472 = vmatmul.mubr.msk.bf16.gmra.mrb[24].mxu1 %vm146_vm0, %v120_v32 }
  0x3b   :  { %2443 = vmatprep.mubr.msk.bf16.mxu0 %vm146_vm0, %v105_v25  ;;  %2475 = vmatprep.mubr.msk.bf16.mxu1 %vm146_vm0, %v121_v34 }
  0x42   :  { %2444 = vmatmul.mubr.msk.bf16.gmra.mrb[28].mxu0 %vm146_vm0, %v106_v33  ;;  %2476 = vmatmul.mubr.msk.bf16.gmra.mrb[28].mxu1 %vm146_vm0, %v122_v37 }
  0xdd   :  { %v2417_v39 = vpop.f32.mrb[0].mxu0  ;;  %v2449_v54 = vpop.f32.mrb[0].mxu1 }
  0xde   :  { %v286_v40 = vadd.f32 %v2417_v39, %v2916_v38  ;;  %v277_v41 = vpop.f32.mrb[1].mxu0  ;;  %v414_v57 = vadd.f32 %v2449_v54, %v2916_v38  ;;  %v405_v58 = vpop.f32.mrb[1].mxu1 }
  0xdf   :  { %v278_v42 = vadd.f32 %v2916_v38, %v277_v41  ;;  %v2418_v43 = vpop.f32.mrb[2].mxu0  ;;  %v406_v61 = vadd.f32 %v2916_v38, %v405_v58  ;;  %v2450_v62 = vpop.f32.mrb[2].mxu1 }
  0xe0   :  { %v289_v44 = vadd.f32 %v2418_v43, %v2916_v38  ;;  %v280_v45 = vpop.f32.mrb[3].mxu0  ;;  %v534_v46 = vmax.f32 %v286_v40, 0.0  ;;  %v566_v1 = vmax.f32 %v414_v57, 0.0  ;;  %v417_v2 = vadd.f32 %v2450_v62, %v2916_v38  ;;  %v408_v3 = vpop.f32.mrb[3].mxu1 }
  0xe1   :  { %v281_v47 = vadd.f32 %v2916_v38, %v280_v45  ;;  %v532_v51 = vmax.f32 %v278_v42, 0.0  ;;  %v564_v6 = vmax.f32 %v406_v61, 0.0  ;;  %v409_v7 = vadd.f32 %v2916_v38, %v408_v3 }
  0xe2   :  { %v535_v49 = vmax.f32 %v289_v44, 0.0  ;;  %v567_v9 = vmax.f32 %v417_v2, 0.0 }
  0xe3   :  { %v533_v52 = vmax.f32 %v281_v47, 0.0  ;;  %v565_v12 = vmax.f32 %v409_v7, 0.0 }
  0xe4   :  { %v597_v53 = vpack.c.bf16 %v535_v49, %v534_v46  ;;  %v2938_v15 = vpack.c.bf16 %v567_v9, %v566_v1 }
  0xe5   :  { %v596_v55 = vpack.c.bf16 %v533_v52, %v532_v51  ;;  %v2421_v56 = vpop.f32.mrb[4].mxu0  ;;  %v2940_v17 = vpack.c.bf16 %v565_v12, %v564_v6  ;;  %v2453_v18 = vpop.f32.mrb[4].mxu1 }
  0xe6   :  { %v302_v59 = vadd.f32 %v2421_v56, %v2916_v38  ;;  %v293_v60 = vpop.f32.mrb[5].mxu0  ;;  %v430_v21 = vadd.f32 %v2453_v18, %v2916_v38  ;;  %v421_v22 = vpop.f32.mrb[5].mxu1 }
  0xe7   :  { %v294_v63 = vadd.f32 %v2916_v38, %v293_v60  ;;  %v2422_v0 = vpop.f32.mrb[6].mxu0  ;;  %2487 = vmatprep.mubr.msk.bf16.mxu1 %vm667_vm1, %v596_v55  ;;  %v422_v25 = vadd.f32 %v2916_v38, %v421_v22  ;;  %v2454_v26 = vpop.f32.mrb[6].mxu1 }
  0xe8   :  { %v305_v4 = vadd.f32 %v2422_v0, %v2916_v38  ;;  %v296_v5 = vpop.f32.mrb[7].mxu0  ;;  %2488 = vmatmul.mubr.msk.bf16.vlgmr.msra.gmra.mrb[32].mxu1 %vm667_vm1, %v597_v53  ;;  %v538_v10 = vmax.f32 %v302_v59, 0.0  ;;  %v570_v29 = vmax.f32 %v430_v21, 0.0  ;;  %v433_v30 = vadd.f32 %v2454_v26, %v2916_v38  ;;  %v424_v31 = vpop.f32.mrb[7].mxu1 }
  0xe9   :  { %v297_v8 = vadd.f32 %v2916_v38, %v296_v5  ;;  %v536_v13 = vmax.f32 %v294_v63, 0.0  ;;  %v568_v34 = vmax.f32 %v422_v25, 0.0  ;;  %v425_v35 = vadd.f32 %v2916_v38, %v424_v31 }
  0xea   :  { %v539_v11 = vmax.f32 %v305_v4, 0.0  ;;  %v571_v37 = vmax.f32 %v433_v30, 0.0 }
  0xeb   :  { %v537_v14 = vmax.f32 %v297_v8, 0.0  ;;  %v569_v41 = vmax.f32 %v425_v35, 0.0 }
  0xec   :  { %v599_v16 = vpack.c.bf16 %v539_v11, %v538_v10  ;;  %v2952_v44 = vpack.c.bf16 %v571_v37, %v570_v29 }
  0xed   :  { %v598_v19 = vpack.c.bf16 %v537_v14, %v536_v13  ;;  %v2425_v20 = vpop.f32.mrb[8].mxu0  ;;  %v2954_v46 = vpack.c.bf16 %v569_v41, %v568_v34  ;;  %v2457_v47 = vpop.f32.mrb[8].mxu1 }
  0xee   :  { %v318_v23 = vadd.f32 %v2425_v20, %v2916_v38  ;;  %v309_v24 = vpop.f32.mrb[9].mxu0  ;;  %v446_v50 = vadd.f32 %v2457_v47, %v2916_v38  ;;  %v437_v51 = vpop.f32.mrb[9].mxu1 }
  0xef   :  { %v310_v27 = vadd.f32 %v2916_v38, %v309_v24  ;;  %v2426_v28 = vpop.f32.mrb[10].mxu0  ;;  %2491 = vmatprep.mubr.msk.bf16.mxu1 %vm667_vm1, %v598_v19  ;;  %v438_v54 = vadd.f32 %v2916_v38, %v437_v51  ;;  %v2458_v55 = vpop.f32.mrb[10].mxu1 }
  0xf0   :  { %v321_v32 = vadd.f32 %v2426_v28, %v2916_v38  ;;  %v312_v33 = vpop.f32.mrb[11].mxu0  ;;  %2492 = vmatmul.mubr.msk.bf16.gmra.mrb[36].mxu1 %vm667_vm1, %v599_v16  ;;  %v542_v39 = vmax.f32 %v318_v23, 0.0  ;;  %v574_v58 = vmax.f32 %v446_v50, 0.0  ;;  %v449_v59 = vadd.f32 %v2458_v55, %v2916_v38  ;;  %v440_v60 = vpop.f32.mrb[11].mxu1 }
  0xf1   :  { %v313_v36 = vadd.f32 %v2916_v38, %v312_v33  ;;  %v540_v42 = vmax.f32 %v310_v27, 0.0  ;;  %v572_v63 = vmax.f32 %v438_v54, 0.0  ;;  %v441_v0 = vadd.f32 %v2916_v38, %v440_v60 }
  0xf2   :  { %v543_v40 = vmax.f32 %v321_v32, 0.0  ;;  %v575_v2 = vmax.f32 %v449_v59, 0.0 }
  0xf3   :  { %v541_v43 = vmax.f32 %v313_v36, 0.0  ;;  %v573_v5 = vmax.f32 %v441_v0, 0.0 }
  0xf4   :  { %v601_v45 = vpack.c.bf16 %v543_v40, %v542_v39  ;;  %v2966_v8 = vpack.c.bf16 %v575_v2, %v574_v58 }
  0xf5   :  { %v600_v48 = vpack.c.bf16 %v541_v43, %v540_v42  ;;  %v2429_v49 = vpop.f32.mrb[12].mxu0  ;;  %v2968_v10 = vpack.c.bf16 %v573_v5, %v572_v63  ;;  %v2461_v11 = vpop.f32.mrb[12].mxu1 }
  0xf6   :  { %v334_v52 = vadd.f32 %v2429_v49, %v2916_v38  ;;  %v325_v53 = vpop.f32.mrb[13].mxu0  ;;  %v462_v14 = vadd.f32 %v2461_v11, %v2916_v38  ;;  %v453_v16 = vpop.f32.mrb[13].mxu1 }
  0xf7   :  { %v326_v56 = vadd.f32 %v2916_v38, %v325_v53  ;;  %v2430_v57 = vpop.f32.mrb[14].mxu0  ;;  %2495 = vmatprep.mubr.msk.bf16.mxu1 %vm667_vm1, %v600_v48  ;;  %v454_v20 = vadd.f32 %v2916_v38, %v453_v16  ;;  %v2462_v21 = vpop.f32.mrb[14].mxu1 }
  0xf8   :  { %v337_v61 = vadd.f32 %v2430_v57, %v2916_v38  ;;  %v328_v62 = vpop.f32.mrb[15].mxu0  ;;  %2496 = vmatmul.mubr.msk.bf16.gmra.mrb[40].mxu1 %vm667_vm1, %v601_v45  ;;  %v546_v3 = vmax.f32 %v334_v52, 0.0  ;;  %v578_v24 = vmax.f32 %v462_v14, 0.0  ;;  %v465_v25 = vadd.f32 %v2462_v21, %v2916_v38  ;;  %v456_v26 = vpop.f32.mrb[15].mxu1 }
  0xf9   :  { %v329_v1 = vadd.f32 %v2916_v38, %v328_v62  ;;  %v544_v6 = vmax.f32 %v326_v56, 0.0  ;;  %v576_v29 = vmax.f32 %v454_v20, 0.0  ;;  %v457_v30 = vadd.f32 %v2916_v38, %v456_v26 }
  0xfa   :  { %v547_v4 = vmax.f32 %v337_v61, 0.0  ;;  %v579_v32 = vmax.f32 %v465_v25, 0.0 }
  0xfb   :  { %v545_v7 = vmax.f32 %v329_v1, 0.0  ;;  %v577_v35 = vmax.f32 %v457_v30, 0.0 }
  0xfc   :  { %v603_v9 = vpack.c.bf16 %v547_v4, %v546_v3  ;;  %v2980_v39 = vpack.c.bf16 %v579_v32, %v578_v24 }
  0xfd   :  { %v602_v12 = vpack.c.bf16 %v545_v7, %v544_v6  ;;  %v2433_v13 = vpop.f32.mrb[16].mxu0  ;;  %v2982_v41 = vpack.c.bf16 %v577_v35, %v576_v29  ;;  %v2465_v42 = vpop.f32.mrb[16].mxu1 }
  0xfe   :  { %v350_v18 = vadd.f32 %v2433_v13, %v2916_v38  ;;  %v341_v19 = vpop.f32.mrb[17].mxu0  ;;  %v478_v47 = vadd.f32 %v2465_v42, %v2916_v38  ;;  %v469_v48 = vpop.f32.mrb[17].mxu1 }
  0xff   :  { %v342_v22 = vadd.f32 %v2916_v38, %v341_v19  ;;  %v2434_v23 = vpop.f32.mrb[18].mxu0  ;;  %2499 = vmatprep.mubr.msk.bf16.mxu1 %vm667_vm1, %v602_v12  ;;  %v470_v51 = vadd.f32 %v2916_v38, %v469_v48  ;;  %v2466_v52 = vpop.f32.mrb[18].mxu1 }
 0x100   :  { %v353_v27 = vadd.f32 %v2434_v23, %v2916_v38  ;;  %v344_v28 = vpop.f32.mrb[19].mxu0  ;;  %2500 = vmatmul.mubr.msk.bf16.gmra.mrb[44].mxu1 %vm667_vm1, %v603_v9  ;;  %v550_v33 = vmax.f32 %v350_v18, 0.0  ;;  %v582_v55 = vmax.f32 %v478_v47, 0.0  ;;  %v481_v56 = vadd.f32 %v2466_v52, %v2916_v38  ;;  %v472_v57 = vpop.f32.mrb[19].mxu1 }
 0x101   :  { %v345_v31 = vadd.f32 %v2916_v38, %v344_v28  ;;  %v548_v36 = vmax.f32 %v342_v22, 0.0  ;;  %v580_v60 = vmax.f32 %v470_v51, 0.0  ;;  %v473_v61 = vadd.f32 %v2916_v38, %v472_v57 }
 0x102   :  { %v551_v34 = vmax.f32 %v353_v27, 0.0  ;;  %v583_v63 = vmax.f32 %v481_v56, 0.0 }
 0x103   :  { %v549_v37 = vmax.f32 %v345_v31, 0.0  ;;  %v581_v2 = vmax.f32 %v473_v61, 0.0 }
 0x104   :  { %v605_v40 = vpack.c.bf16 %v551_v34, %v550_v33  ;;  %v2994_v5 = vpack.c.bf16 %v583_v63, %v582_v55 }
 0x105   :  { %v604_v43 = vpack.c.bf16 %v549_v37, %v548_v36  ;;  %v2437_v45 = vpop.f32.mrb[20].mxu0  ;;  %v2996_v7 = vpack.c.bf16 %v581_v2, %v580_v60  ;;  %v2469_v9 = vpop.f32.mrb[20].mxu1 }
 0x106   :  { %v366_v49 = vadd.f32 %v2437_v45, %v2916_v38  ;;  %v357_v50 = vpop.f32.mrb[21].mxu0  ;;  %v494_v13 = vadd.f32 %v2469_v9, %v2916_v38  ;;  %v485_v14 = vpop.f32.mrb[21].mxu1 }
 0x107   :  { %v358_v53 = vadd.f32 %v2916_v38, %v357_v50  ;;  %v2438_v54 = vpop.f32.mrb[22].mxu0  ;;  %2503 = vmatprep.mubr.msk.bf16.mxu1 %vm667_vm1, %v604_v43  ;;  %v486_v19 = vadd.f32 %v2916_v38, %v485_v14  ;;  %v2470_v20 = vpop.f32.mrb[22].mxu1 }
 0x108   :  { %v369_v58 = vadd.f32 %v2438_v54, %v2916_v38  ;;  %v360_v59 = vpop.f32.mrb[23].mxu0  ;;  %2504 = vmatmul.mubr.msk.bf16.gmra.mrb[48].mxu1 %vm667_vm1, %v605_v40  ;;  %v554_v0 = vmax.f32 %v366_v49, 0.0  ;;  %v586_v23 = vmax.f32 %v494_v13, 0.0  ;;  %v497_v24 = vadd.f32 %v2470_v20, %v2916_v38  ;;  %v488_v25 = vpop.f32.mrb[23].mxu1 }
 0x109   :  { %v361_v62 = vadd.f32 %v2916_v38, %v360_v59  ;;  %v552_v3 = vmax.f32 %v358_v53, 0.0  ;;  %v584_v28 = vmax.f32 %v486_v19, 0.0  ;;  %v489_v29 = vadd.f32 %v2916_v38, %v488_v25 }
 0x10a   :  { %v555_v1 = vmax.f32 %v369_v58, 0.0  ;;  %v587_v31 = vmax.f32 %v497_v24, 0.0 }
 0x10b   :  { %v553_v4 = vmax.f32 %v361_v62, 0.0  ;;  %v585_v34 = vmax.f32 %v489_v29, 0.0 }
 0x10c   :  { %v607_v6 = vpack.c.bf16 %v555_v1, %v554_v0  ;;  %v623_v37 = vpack.c.bf16 %v587_v31, %v586_v23 }
 0x10d   :  { %v606_v11 = vpack.c.bf16 %v553_v4, %v552_v3  ;;  %v2441_v12 = vpop.f32.mrb[24].mxu0  ;;  %v622_v42 = vpack.c.bf16 %v585_v34, %v584_v28  ;;  %v2473_v43 = vpop.f32.mrb[24].mxu1 }
 0x10e   :  { %v382_v16 = vadd.f32 %v2441_v12, %v2916_v38  ;;  %v373_v18 = vpop.f32.mrb[25].mxu0  ;;  %v510_v48 = vadd.f32 %v2473_v43, %v2916_v38  ;;  %v501_v49 = vpop.f32.mrb[25].mxu1 }
 0x10f   :  { %v374_v21 = vadd.f32 %v2916_v38, %v373_v18  ;;  %v2442_v22 = vpop.f32.mrb[26].mxu0  ;;  %2507 = vmatprep.mubr.msk.bf16.mxu1 %vm667_vm1, %v606_v11  ;;  %v502_v52 = vadd.f32 %v2916_v38, %v501_v49  ;;  %v2474_v53 = vpop.f32.mrb[26].mxu1 }
 0x110   :  { %v385_v26 = vadd.f32 %v2442_v22, %v2916_v38  ;;  %v376_v27 = vpop.f32.mrb[27].mxu0  ;;  %2508 = vmatmul.mubr.msk.bf16.gmra.mrb[52].mxu1 %vm667_vm1, %v607_v6  ;;  %v558_v32 = vmax.f32 %v382_v16, 0.0  ;;  %v590_v56 = vmax.f32 %v510_v48, 0.0  ;;  %v513_v57 = vadd.f32 %v2474_v53, %v2916_v38  ;;  %v504_v58 = vpop.f32.mrb[27].mxu1 }
 0x111   :  { %v377_v30 = vadd.f32 %v2916_v38, %v376_v27  ;;  %v556_v35 = vmax.f32 %v374_v21, 0.0  ;;  %v588_v61 = vmax.f32 %v502_v52, 0.0  ;;  %v505_v62 = vadd.f32 %v2916_v38, %v504_v58 }
 0x112   :  { %v559_v33 = vmax.f32 %v385_v26, 0.0  ;;  %v591_v0 = vmax.f32 %v513_v57, 0.0 }
 0x113   :  { %v557_v36 = vmax.f32 %v377_v30, 0.0  ;;  %v589_v3 = vmax.f32 %v505_v62, 0.0 }
 0x114   :  { %v609_v40 = vpack.c.bf16 %v559_v33, %v558_v32  ;;  %v625_v9 = vpack.c.bf16 %v591_v0, %v590_v56 }
 0x115   :  { %v608_v45 = vpack.c.bf16 %v557_v36, %v556_v35  ;;  %v2445_v47 = vpop.f32.mrb[28].mxu0  ;;  %v624_v12 = vpack.c.bf16 %v589_v3, %v588_v61  ;;  %v2477_v13 = vpop.f32.mrb[28].mxu1 }
 0x116   :  { %v398_v50 = vadd.f32 %v2445_v47, %v2916_v38  ;;  %v389_v51 = vpop.f32.mrb[29].mxu0  ;;  %v526_v16 = vadd.f32 %v2477_v13, %v2916_v38  ;;  %v517_v18 = vpop.f32.mrb[29].mxu1 }
 0x117   :  { %v390_v54 = vadd.f32 %v2916_v38, %v389_v51  ;;  %v2446_v55 = vpop.f32.mrb[30].mxu0  ;;  %2511 = vmatprep.mubr.msk.bf16.mxu1 %vm667_vm1, %v608_v45  ;;  %v518_v19 = vadd.f32 %v2916_v38, %v517_v18  ;;  %v2478_v20 = vpop.f32.mrb[30].mxu1 }
 0x118   :  { %v401_v59 = vadd.f32 %v2446_v55, %v2916_v38  ;;  %v392_v60 = vpop.f32.mrb[31].mxu0  ;;  %2512 = vmatmul.mubr.msk.bf16.gmra.mrb[56].mxu1 %vm667_vm1, %v609_v40  ;;  %v562_v1 = vmax.f32 %v398_v50, 0.0  ;;  %v594_v21 = vmax.f32 %v526_v16, 0.0  ;;  %v529_v22 = vadd.f32 %v2478_v20, %v2916_v38  ;;  %v520_v23 = vpop.f32.mrb[31].mxu1 }
 0x119   :  { %v393_v63 = vadd.f32 %v2916_v38, %v392_v60  ;;  %v560_v4 = vmax.f32 %v390_v54, 0.0  ;;  %v592_v24 = vmax.f32 %v518_v19, 0.0  ;;  %v521_v25 = vadd.f32 %v2916_v38, %v520_v23  ;;  %v3053_v38 = vld [vmem:[%s3321_s4] ss:$0 sm:$0xff] }
 0x11a   :  { %v563_v2 = vmax.f32 %v401_v59, 0.0  ;;  %v595_v26 = vmax.f32 %v529_v22, 0.0 }
 0x11b   :  { %v561_v6 = vmax.f32 %v393_v63, 0.0  ;;  %v593_v27 = vmax.f32 %v521_v25, 0.0 }
 0x11c   :  { %v611_v11 = vpack.c.bf16 %v563_v2, %v562_v1  ;;  %v627_v28 = vpack.c.bf16 %v595_v26, %v594_v21 }
 0x11d   :  { %v610_v14 = vpack.c.bf16 %v561_v6, %v560_v4  ;;  %v626_v29 = vpack.c.bf16 %v593_v27, %v592_v24 }
 0x11f   :  { %2515 = vmatprep.mubr.msk.bf16.mxu1 %vm667_vm1, %v610_v14 }
 0x120   :  { %2516 = vmatmul.mubr.msk.bf16.gmra.mrb[60].mxu1 %vm667_vm1, %v611_v11 }
 0x121   :  { %2519 = vmatprep.mubr.msk.bf16.mxu1 %vm667_vm1, %v2940_v17 }
 0x128   :  { %2520 = vmatmul.mubr.msk.bf16.gmra.mrb[64].mxu1 %vm667_vm1, %v2938_v15 }
 0x129   :  { %2523 = vmatprep.mubr.msk.bf16.mxu1 %vm667_vm1, %v2954_v46 }
 0x130   :  { %2524 = vmatmul.mubr.msk.bf16.gmra.mrb[68].mxu1 %vm667_vm1, %v2952_v44 }
 0x131   :  { %2527 = vmatprep.mubr.msk.bf16.mxu1 %vm667_vm1, %v2968_v10 }
 0x138   :  { %2528 = vmatmul.mubr.msk.bf16.gmra.mrb[72].mxu1 %vm667_vm1, %v2966_v8 }
 0x139   :  { %2531 = vmatprep.mubr.msk.bf16.mxu1 %vm667_vm1, %v2982_v41 }
 0x140   :  { %2532 = vmatmul.mubr.msk.bf16.gmra.mrb[76].mxu1 %vm667_vm1, %v2980_v39 }
 0x141   :  { %2535 = vmatprep.mubr.msk.bf16.mxu1 %vm667_vm1, %v2996_v7 }
 0x148   :  { %2536 = vmatmul.mubr.msk.bf16.gmra.mrb[80].mxu1 %vm667_vm1, %v2994_v5 }
 0x149   :  { %2539 = vmatprep.mubr.msk.bf16.mxu1 %vm667_vm1, %v622_v42 }
 0x150   :  { %2540 = vmatmul.mubr.msk.bf16.gmra.mrb[84].mxu1 %vm667_vm1, %v623_v37 }
 0x151   :  { %2543 = vmatprep.mubr.msk.bf16.mxu1 %vm667_vm1, %v624_v12 }
 0x158   :  { %2544 = vmatmul.mubr.msk.bf16.gmra.mrb[88].mxu1 %vm667_vm1, %v625_v9 }
 0x159   :  { %2547 = vmatprep.mubr.msk.bf16.mxu1 %vm667_vm1, %v626_v29 }
 0x160   :  { %2548 = vmatmul.mubr.msk.bf16.gmra.mrb[92].mxu1 %vm667_vm1, %v627_v28 }
 0x1bb   :  { %v2489_v15 = vpop.f32.mrb[32].mxu1 }
 0x1bc   :  { %v807_v17 = vadd.f32 %v2489_v15, %v3053_v38  ;;  %v798_v44 = vpop.f32.mrb[33].mxu1 }
 0x1bd   :  { %v799_v46 = vadd.f32 %v3053_v38, %v798_v44  ;;  %v2490_v8 = vpop.f32.mrb[34].mxu1 }
 0x1be   :  { %v810_v10 = vadd.f32 %v2490_v8, %v3053_v38  ;;  %v801_v39 = vpop.f32.mrb[35].mxu1  ;;  %v1055_v5 = vmax.f32 %v807_v17, 0.0 }
 0x1bf   :  { %v802_v41 = vadd.f32 %v3053_v38, %v801_v39  ;;  %v1053_v30 = vmax.f32 %v799_v46, 0.0 }
 0x1c0   :  { %v1056_v7 = vmax.f32 %v810_v10, 0.0 }
 0x1c1   :  { %v1054_v31 = vmax.f32 %v802_v41, 0.0 }
 0x1c2   :  { %v1118_v32 = vpack.c.bf16 %v1056_v7, %v1055_v5 }
 0x1c3   :  { %v1117_v33 = vpack.c.bf16 %v1054_v31, %v1053_v30  ;;  %v2493_v34 = vpop.f32.mrb[36].mxu1 }
 0x1c4   :  { %v823_v35 = vadd.f32 %v2493_v34, %v3053_v38  ;;  %v814_v36 = vpop.f32.mrb[37].mxu1 }
 0x1c5   :  { %v815_v37 = vadd.f32 %v3053_v38, %v814_v36  ;;  %v2494_v40 = vpop.f32.mrb[38].mxu1  ;;  %2555 = vmatprep.mubr.msk.bf16.mxu0 %vm146_vm0, %v1117_v33 }
 0x1c6   :  { %v826_v42 = vadd.f32 %v2494_v40, %v3053_v38  ;;  %v817_v43 = vpop.f32.mrb[39].mxu1  ;;  %2556 = vmatmul.mubr.msk.bf16.vlgmr.msra.gmra.mrb[32].mxu0 %vm146_vm0, %v1118_v32  ;;  %v1059_v47 = vmax.f32 %v823_v35, 0.0 }
 0x1c7   :  { %v818_v45 = vadd.f32 %v3053_v38, %v817_v43  ;;  %v1057_v49 = vmax.f32 %v815_v37, 0.0 }
 0x1c8   :  { %v1060_v48 = vmax.f32 %v826_v42, 0.0 }
 0x1c9   :  { %v1058_v50 = vmax.f32 %v818_v45, 0.0 }
 0x1ca   :  { %v1120_v51 = vpack.c.bf16 %v1060_v48, %v1059_v47 }
 0x1cb   :  { %v1119_v52 = vpack.c.bf16 %v1058_v50, %v1057_v49  ;;  %v2497_v53 = vpop.f32.mrb[40].mxu1 }
 0x1cc   :  { %v839_v54 = vadd.f32 %v2497_v53, %v3053_v38  ;;  %v830_v55 = vpop.f32.mrb[41].mxu1 }
 0x1cd   :  { %v831_v56 = vadd.f32 %v3053_v38, %v830_v55  ;;  %v2498_v57 = vpop.f32.mrb[42].mxu1  ;;  %2559 = vmatprep.mubr.msk.bf16.mxu0 %vm146_vm0, %v1119_v52 }
 0x1ce   :  { %v842_v58 = vadd.f32 %v2498_v57, %v3053_v38  ;;  %v833_v59 = vpop.f32.mrb[43].mxu1  ;;  %2560 = vmatmul.mubr.msk.bf16.gmra.mrb[36].mxu0 %vm146_vm0, %v1120_v51  ;;  %v1063_v61 = vmax.f32 %v839_v54, 0.0 }
 0x1cf   :  { %v834_v60 = vadd.f32 %v3053_v38, %v833_v59  ;;  %v1061_v63 = vmax.f32 %v831_v56, 0.0 }
 0x1d0   :  { %v1064_v62 = vmax.f32 %v842_v58, 0.0 }
 0x1d1   :  { %v1062_v0 = vmax.f32 %v834_v60, 0.0 }
 0x1d2   :  { %v1122_v1 = vpack.c.bf16 %v1064_v62, %v1063_v61 }
 0x1d3   :  { %v1121_v2 = vpack.c.bf16 %v1062_v0, %v1061_v63  ;;  %v2501_v3 = vpop.f32.mrb[44].mxu1 }
 0x1d4   :  { %v855_v4 = vadd.f32 %v2501_v3, %v3053_v38  ;;  %v846_v6 = vpop.f32.mrb[45].mxu1 }
 0x1d5   :  { %v847_v9 = vadd.f32 %v3053_v38, %v846_v6  ;;  %v2502_v11 = vpop.f32.mrb[46].mxu1  ;;  %2563 = vmatprep.mubr.msk.bf16.mxu0 %vm146_vm0, %v1121_v2 }
 0x1d6   :  { %v858_v12 = vadd.f32 %v2502_v11, %v3053_v38  ;;  %v849_v13 = vpop.f32.mrb[47].mxu1  ;;  %2564 = vmatmul.mubr.msk.bf16.gmra.mrb[40].mxu0 %vm146_vm0, %v1122_v1  ;;  %v1067_v16 = vmax.f32 %v855_v4, 0.0 }
 0x1d7   :  { %v850_v14 = vadd.f32 %v3053_v38, %v849_v13  ;;  %v1065_v19 = vmax.f32 %v847_v9, 0.0 }
 0x1d8   :  { %v1068_v18 = vmax.f32 %v858_v12, 0.0 }
 0x1d9   :  { %v1066_v20 = vmax.f32 %v850_v14, 0.0 }
 0x1da   :  { %v1124_v21 = vpack.c.bf16 %v1068_v18, %v1067_v16 }
 0x1db   :  { %v1123_v22 = vpack.c.bf16 %v1066_v20, %v1065_v19  ;;  %v2505_v23 = vpop.f32.mrb[48].mxu1 }
 0x1dc   :  { %v871_v24 = vadd.f32 %v2505_v23, %v3053_v38  ;;  %v862_v25 = vpop.f32.mrb[49].mxu1 }
 0x1dd   :  { %v863_v26 = vadd.f32 %v3053_v38, %v862_v25  ;;  %v2506_v27 = vpop.f32.mrb[50].mxu1  ;;  %2567 = vmatprep.mubr.msk.bf16.mxu0 %vm146_vm0, %v1123_v22 }
 0x1de   :  { %v874_v28 = vadd.f32 %v2506_v27, %v3053_v38  ;;  %v865_v29 = vpop.f32.mrb[51].mxu1  ;;  %2568 = vmatmul.mubr.msk.bf16.gmra.mrb[44].mxu0 %vm146_vm0, %v1124_v21  ;;  %v1071_v17 = vmax.f32 %v871_v24, 0.0 }
 0x1df   :  { %v866_v15 = vadd.f32 %v3053_v38, %v865_v29  ;;  %v1069_v46 = vmax.f32 %v863_v26, 0.0 }
 0x1e0   :  { %v1072_v44 = vmax.f32 %v874_v28, 0.0 }
 0x1e1   :  { %v1070_v8 = vmax.f32 %v866_v15, 0.0 }
 0x1e2   :  { %v1126_v10 = vpack.c.bf16 %v1072_v44, %v1071_v17 }
 0x1e3   :  { %v1125_v39 = vpack.c.bf16 %v1070_v8, %v1069_v46  ;;  %v2509_v41 = vpop.f32.mrb[52].mxu1 }
 0x1e4   :  { %v887_v5 = vadd.f32 %v2509_v41, %v3053_v38  ;;  %v878_v7 = vpop.f32.mrb[53].mxu1 }
 0x1e5   :  { %v879_v30 = vadd.f32 %v3053_v38, %v878_v7  ;;  %v2510_v31 = vpop.f32.mrb[54].mxu1  ;;  %2571 = vmatprep.mubr.msk.bf16.mxu0 %vm146_vm0, %v1125_v39 }
 0x1e6   :  { %v890_v32 = vadd.f32 %v2510_v31, %v3053_v38  ;;  %v881_v33 = vpop.f32.mrb[55].mxu1  ;;  %2572 = vmatmul.mubr.msk.bf16.gmra.mrb[48].mxu0 %vm146_vm0, %v1126_v10  ;;  %v1075_v35 = vmax.f32 %v887_v5, 0.0 }
 0x1e7   :  { %v882_v34 = vadd.f32 %v3053_v38, %v881_v33  ;;  %v1073_v37 = vmax.f32 %v879_v30, 0.0 }
 0x1e8   :  { %v1076_v36 = vmax.f32 %v890_v32, 0.0 }
 0x1e9   :  { %v1074_v40 = vmax.f32 %v882_v34, 0.0 }
 0x1ea   :  { %v1128_v42 = vpack.c.bf16 %v1076_v36, %v1075_v35 }
 0x1eb   :  { %v1127_v43 = vpack.c.bf16 %v1074_v40, %v1073_v37  ;;  %v2513_v45 = vpop.f32.mrb[56].mxu1 }
 0x1ec   :  { %v903_v47 = vadd.f32 %v2513_v45, %v3053_v38  ;;  %v894_v48 = vpop.f32.mrb[57].mxu1 }
 0x1ed   :  { %v895_v49 = vadd.f32 %v3053_v38, %v894_v48  ;;  %v2514_v50 = vpop.f32.mrb[58].mxu1  ;;  %2575 = vmatprep.mubr.msk.bf16.mxu0 %vm146_vm0, %v1127_v43 }
 0x1ee   :  { %v906_v51 = vadd.f32 %v2514_v50, %v3053_v38  ;;  %v897_v52 = vpop.f32.mrb[59].mxu1  ;;  %2576 = vmatmul.mubr.msk.bf16.gmra.mrb[52].mxu0 %vm146_vm0, %v1128_v42  ;;  %v1079_v54 = vmax.f32 %v903_v47, 0.0 }
 0x1ef   :  { %v898_v53 = vadd.f32 %v3053_v38, %v897_v52  ;;  %v1077_v56 = vmax.f32 %v895_v49, 0.0 }
 0x1f0   :  { %v1080_v55 = vmax.f32 %v906_v51, 0.0 }
 0x1f1   :  { %v1078_v57 = vmax.f32 %v898_v53, 0.0 }
 0x1f2   :  { %v1130_v58 = vpack.c.bf16 %v1080_v55, %v1079_v54 }
 0x1f3   :  { %v1129_v59 = vpack.c.bf16 %v1078_v57, %v1077_v56  ;;  %v2517_v60 = vpop.f32.mrb[60].mxu1 }
 0x1f4   :  { %v919_v61 = vadd.f32 %v2517_v60, %v3053_v38  ;;  %v910_v62 = vpop.f32.mrb[61].mxu1 }
 0x1f5   :  { %v911_v63 = vadd.f32 %v3053_v38, %v910_v62  ;;  %v2518_v0 = vpop.f32.mrb[62].mxu1  ;;  %2579 = vmatprep.mubr.msk.bf16.mxu0 %vm146_vm0, %v1129_v59 }
 0x1f6   :  { %v922_v1 = vadd.f32 %v2518_v0, %v3053_v38  ;;  %v913_v2 = vpop.f32.mrb[63].mxu1  ;;  %2580 = vmatmul.mubr.msk.bf16.gmra.mrb[56].mxu0 %vm146_vm0, %v1130_v58  ;;  %v1083_v4 = vmax.f32 %v919_v61, 0.0 }
 0x1f7   :  { %v914_v3 = vadd.f32 %v3053_v38, %v913_v2  ;;  %v1081_v9 = vmax.f32 %v911_v63, 0.0 }
 0x1f8   :  { %v1084_v6 = vmax.f32 %v922_v1, 0.0 }
 0x1f9   :  { %v1082_v11 = vmax.f32 %v914_v3, 0.0 }
 0x1fa   :  { %v1132_v12 = vpack.c.bf16 %v1084_v6, %v1083_v4 }
 0x1fb   :  { %v1131_v13 = vpack.c.bf16 %v1082_v11, %v1081_v9  ;;  %v2521_v14 = vpop.f32.mrb[64].mxu1 }
 0x1fc   :  { %v935_v16 = vadd.f32 %v2521_v14, %v3053_v38  ;;  %v926_v18 = vpop.f32.mrb[65].mxu1 }
 0x1fd   :  { %v927_v19 = vadd.f32 %v3053_v38, %v926_v18  ;;  %v2522_v20 = vpop.f32.mrb[66].mxu1  ;;  %2583 = vmatprep.mubr.msk.bf16.mxu0 %vm146_vm0, %v1131_v13 }
 0x1fe   :  { %v938_v21 = vadd.f32 %v2522_v20, %v3053_v38  ;;  %v929_v22 = vpop.f32.mrb[67].mxu1  ;;  %2584 = vmatmul.mubr.msk.bf16.gmra.mrb[60].mxu0 %vm146_vm0, %v1132_v12  ;;  %v1087_v24 = vmax.f32 %v935_v16, 0.0 }
 0x1ff   :  { %v930_v23 = vadd.f32 %v3053_v38, %v929_v22  ;;  %v1085_v26 = vmax.f32 %v927_v19, 0.0 }
 0x200   :  { %v1088_v25 = vmax.f32 %v938_v21, 0.0 }
 0x201   :  { %v1086_v27 = vmax.f32 %v930_v23, 0.0 }
 0x202   :  { %v1134_v28 = vpack.c.bf16 %v1088_v25, %v1087_v24 }
 0x203   :  { %v1133_v29 = vpack.c.bf16 %v1086_v27, %v1085_v26  ;;  %v2525_v15 = vpop.f32.mrb[68].mxu1 }
 0x204   :  { %v951_v17 = vadd.f32 %v2525_v15, %v3053_v38  ;;  %v942_v44 = vpop.f32.mrb[69].mxu1 }
 0x205   :  { %v943_v46 = vadd.f32 %v3053_v38, %v942_v44  ;;  %v2526_v8 = vpop.f32.mrb[70].mxu1  ;;  %2587 = vmatprep.mubr.msk.bf16.mxu0 %vm146_vm0, %v1133_v29 }
 0x206   :  { %v954_v10 = vadd.f32 %v2526_v8, %v3053_v38  ;;  %v945_v39 = vpop.f32.mrb[71].mxu1  ;;  %2588 = vmatmul.mubr.msk.bf16.gmra.mrb[64].mxu0 %vm146_vm0, %v1134_v28  ;;  %v1091_v5 = vmax.f32 %v951_v17, 0.0 }
 0x207   :  { %v946_v41 = vadd.f32 %v3053_v38, %v945_v39  ;;  %v1089_v30 = vmax.f32 %v943_v46, 0.0 }
 0x208   :  { %v1092_v7 = vmax.f32 %v954_v10, 0.0 }
 0x209   :  { %v1090_v31 = vmax.f32 %v946_v41, 0.0 }
 0x20a   :  { %v1136_v32 = vpack.c.bf16 %v1092_v7, %v1091_v5 }
 0x20b   :  { %v1135_v33 = vpack.c.bf16 %v1090_v31, %v1089_v30  ;;  %v2529_v34 = vpop.f32.mrb[72].mxu1 }
 0x20c   :  { %v967_v35 = vadd.f32 %v2529_v34, %v3053_v38  ;;  %v958_v36 = vpop.f32.mrb[73].mxu1 }
 0x20d   :  { %v959_v37 = vadd.f32 %v3053_v38, %v958_v36  ;;  %v2530_v40 = vpop.f32.mrb[74].mxu1  ;;  %2591 = vmatprep.mubr.msk.bf16.mxu0 %vm146_vm0, %v1135_v33 }
 0x20e   :  { %v970_v42 = vadd.f32 %v2530_v40, %v3053_v38  ;;  %v961_v43 = vpop.f32.mrb[75].mxu1  ;;  %2592 = vmatmul.mubr.msk.bf16.gmra.mrb[68].mxu0 %vm146_vm0, %v1136_v32  ;;  %v1095_v47 = vmax.f32 %v967_v35, 0.0 }
 0x20f   :  { %v962_v45 = vadd.f32 %v3053_v38, %v961_v43  ;;  %v1093_v49 = vmax.f32 %v959_v37, 0.0 }
 0x210   :  { %v1096_v48 = vmax.f32 %v970_v42, 0.0 }
 0x211   :  { %v1094_v50 = vmax.f32 %v962_v45, 0.0 }
 0x212   :  { %v1138_v51 = vpack.c.bf16 %v1096_v48, %v1095_v47 }
 0x213   :  { %v1137_v52 = vpack.c.bf16 %v1094_v50, %v1093_v49  ;;  %v2533_v53 = vpop.f32.mrb[76].mxu1 }
 0x214   :  { %v983_v54 = vadd.f32 %v2533_v53, %v3053_v38  ;;  %v974_v55 = vpop.f32.mrb[77].mxu1 }
 0x215   :  { %v975_v56 = vadd.f32 %v3053_v38, %v974_v55  ;;  %v2534_v57 = vpop.f32.mrb[78].mxu1  ;;  %2595 = vmatprep.mubr.msk.bf16.mxu0 %vm146_vm0, %v1137_v52 }
 0x216   :  { %v986_v58 = vadd.f32 %v2534_v57, %v3053_v38  ;;  %v977_v59 = vpop.f32.mrb[79].mxu1  ;;  %2596 = vmatmul.mubr.msk.bf16.gmra.mrb[72].mxu0 %vm146_vm0, %v1138_v51  ;;  %v1099_v61 = vmax.f32 %v983_v54, 0.0 }
 0x217   :  { %v978_v60 = vadd.f32 %v3053_v38, %v977_v59  ;;  %v1097_v63 = vmax.f32 %v975_v56, 0.0 }
 0x218   :  { %v1100_v62 = vmax.f32 %v986_v58, 0.0 }
 0x219   :  { %v1098_v0 = vmax.f32 %v978_v60, 0.0 }
 0x21a   :  { %v1140_v1 = vpack.c.bf16 %v1100_v62, %v1099_v61  ;;  %v3154_v61 = vld [vmem:[%s3322_s6] ss:$0 sm:$0xff] }
 0x21b   :  { %v1139_v2 = vpack.c.bf16 %v1098_v0, %v1097_v63  ;;  %v2537_v3 = vpop.f32.mrb[80].mxu1 }
 0x21c   :  { %v999_v4 = vadd.f32 %v2537_v3, %v3053_v38  ;;  %v990_v6 = vpop.f32.mrb[81].mxu1 }
 0x21d   :  { %v991_v9 = vadd.f32 %v3053_v38, %v990_v6  ;;  %v2538_v11 = vpop.f32.mrb[82].mxu1  ;;  %2599 = vmatprep.mubr.msk.bf16.mxu0 %vm146_vm0, %v1139_v2 }
 0x21e   :  { %v1002_v12 = vadd.f32 %v2538_v11, %v3053_v38  ;;  %v993_v13 = vpop.f32.mrb[83].mxu1  ;;  %2600 = vmatmul.mubr.msk.bf16.gmra.mrb[76].mxu0 %vm146_vm0, %v1140_v1  ;;  %v1103_v16 = vmax.f32 %v999_v4, 0.0 }
 0x21f   :  { %v994_v14 = vadd.f32 %v3053_v38, %v993_v13  ;;  %v1101_v19 = vmax.f32 %v991_v9, 0.0 }
 0x220   :  { %v1104_v18 = vmax.f32 %v1002_v12, 0.0 }
 0x221   :  { %v1102_v20 = vmax.f32 %v994_v14, 0.0 }
 0x222   :  { %v1142_v21 = vpack.c.bf16 %v1104_v18, %v1103_v16 }
 0x223   :  { %v1141_v22 = vpack.c.bf16 %v1102_v20, %v1101_v19  ;;  %v2541_v23 = vpop.f32.mrb[84].mxu1 }
 0x224   :  { %v1015_v24 = vadd.f32 %v2541_v23, %v3053_v38  ;;  %v1006_v25 = vpop.f32.mrb[85].mxu1 }
 0x225   :  { %v1007_v26 = vadd.f32 %v3053_v38, %v1006_v25  ;;  %v2542_v27 = vpop.f32.mrb[86].mxu1  ;;  %2603 = vmatprep.mubr.msk.bf16.mxu0 %vm146_vm0, %v1141_v22 }
 0x226   :  { %v1018_v28 = vadd.f32 %v2542_v27, %v3053_v38  ;;  %v1009_v29 = vpop.f32.mrb[87].mxu1  ;;  %2604 = vmatmul.mubr.msk.bf16.gmra.mrb[80].mxu0 %vm146_vm0, %v1142_v21  ;;  %v1107_v17 = vmax.f32 %v1015_v24, 0.0 }
 0x227   :  { %v1010_v15 = vadd.f32 %v3053_v38, %v1009_v29  ;;  %v1105_v46 = vmax.f32 %v1007_v26, 0.0 }
 0x228   :  { %v1108_v44 = vmax.f32 %v1018_v28, 0.0 }
 0x229   :  { %v1106_v8 = vmax.f32 %v1010_v15, 0.0 }
 0x22a   :  { %v1144_v10 = vpack.c.bf16 %v1108_v44, %v1107_v17 }
 0x22b   :  { %v1143_v39 = vpack.c.bf16 %v1106_v8, %v1105_v46  ;;  %v2545_v41 = vpop.f32.mrb[88].mxu1 }
 0x22c   :  { %v1031_v5 = vadd.f32 %v2545_v41, %v3053_v38  ;;  %v1022_v7 = vpop.f32.mrb[89].mxu1 }
 0x22d   :  { %v1023_v30 = vadd.f32 %v3053_v38, %v1022_v7  ;;  %v2546_v31 = vpop.f32.mrb[90].mxu1  ;;  %2607 = vmatprep.mubr.msk.bf16.mxu0 %vm146_vm0, %v1143_v39 }
 0x22e   :  { %v1034_v32 = vadd.f32 %v2546_v31, %v3053_v38  ;;  %v1025_v33 = vpop.f32.mrb[91].mxu1  ;;  %2608 = vmatmul.mubr.msk.bf16.gmra.mrb[84].mxu0 %vm146_vm0, %v1144_v10  ;;  %v1111_v35 = vmax.f32 %v1031_v5, 0.0 }
 0x22f   :  { %v1026_v34 = vadd.f32 %v3053_v38, %v1025_v33  ;;  %v1109_v37 = vmax.f32 %v1023_v30, 0.0 }
 0x230   :  { %v1112_v36 = vmax.f32 %v1034_v32, 0.0 }
 0x231   :  { %v1110_v40 = vmax.f32 %v1026_v34, 0.0 }
 0x232   :  { %v1146_v42 = vpack.c.bf16 %v1112_v36, %v1111_v35 }
 0x233   :  { %v1145_v43 = vpack.c.bf16 %v1110_v40, %v1109_v37  ;;  %v2549_v45 = vpop.f32.mrb[92].mxu1 }
 0x234   :  { %v1047_v47 = vadd.f32 %v2549_v45, %v3053_v38  ;;  %v1038_v48 = vpop.f32.mrb[93].mxu1 }
 0x235   :  { %v1039_v49 = vadd.f32 %v3053_v38, %v1038_v48  ;;  %v2550_v50 = vpop.f32.mrb[94].mxu1  ;;  %2611 = vmatprep.mubr.msk.bf16.mxu0 %vm146_vm0, %v1145_v43 }
 0x236   :  { %v1050_v51 = vadd.f32 %v2550_v50, %v3053_v38  ;;  %v1041_v52 = vpop.f32.mrb[95].mxu1  ;;  %2612 = vmatmul.mubr.msk.bf16.gmra.mrb[88].mxu0 %vm146_vm0, %v1146_v42  ;;  %v1115_v54 = vmax.f32 %v1047_v47, 0.0 }
 0x237   :  { %v1042_v53 = vadd.f32 %v3053_v38, %v1041_v52  ;;  %v1113_v56 = vmax.f32 %v1039_v49, 0.0 }
 0x238   :  { %v1116_v55 = vmax.f32 %v1050_v51, 0.0 }
 0x239   :  { %v1114_v57 = vmax.f32 %v1042_v53, 0.0 }
 0x23a   :  { %v1148_v58 = vpack.c.bf16 %v1116_v55, %v1115_v54 }
 0x23b   :  { %v1147_v59 = vpack.c.bf16 %v1114_v57, %v1113_v56 }
 0x23d   :  { %2615 = vmatprep.mubr.msk.bf16.mxu0 %vm146_vm0, %v1147_v59 }
 0x23e   :  { %2616 = vmatmul.mubr.msk.bf16.gmra.mrb[92].mxu0 %vm146_vm0, %v1148_v58 }
 0x299   :  { %v2557_v60 = vpop.f32.mrb[32].mxu0 }
 0x29a   :  { %v1302_v62 = vpop.f32.mrb[33].mxu0  ;;  %v1311_v38 = vadd.f32 %v2557_v60, %v3154_v61 }
 0x29b   :  { %v2558_v63 = vpop.f32.mrb[34].mxu0  ;;  %v1303_v2 = vadd.f32 %v3154_v61, %v1302_v62 }
 0x29c   :  { %v1314_v0 = vadd.f32 %v2558_v63, %v3154_v61  ;;  %v1305_v1 = vpop.f32.mrb[35].mxu0 }
 0x29d   :  { %v1306_v3 = vadd.f32 %v3154_v61, %v1305_v1 }
 0x29e   :  { %v2124_v4 = vpack.c.bf16 %v1314_v0, %v1311_v38 }
 0x29f   :  { %v2119_v6 = vpack.c.bf16 %v1306_v3, %v1303_v2 }
 0x2a0   :  { %2276 = vst [vmem:[%s3323_s7 + $0x8] sm:$0xff] %v2124_v4  }
 0x2a1   :  { %2120 = vst [vmem:[%s3323_s7] sm:$0xff] %v2119_v6   ;;  %v2561_v9 = vpop.f32.mrb[36].mxu0 }
 0x2a2   :  { %v1318_v11 = vpop.f32.mrb[37].mxu0  ;;  %v1327_v13 = vadd.f32 %v2561_v9, %v3154_v61 }
 0x2a3   :  { %v2562_v12 = vpop.f32.mrb[38].mxu0  ;;  %v1319_v18 = vadd.f32 %v3154_v61, %v1318_v11 }
 0x2a4   :  { %v1330_v14 = vadd.f32 %v2562_v12, %v3154_v61  ;;  %v1321_v16 = vpop.f32.mrb[39].mxu0 }
 0x2a5   :  { %v1322_v19 = vadd.f32 %v3154_v61, %v1321_v16 }
 0x2a6   :  { %v2134_v20 = vpack.c.bf16 %v1330_v14, %v1327_v13 }
 0x2a7   :  { %v2129_v21 = vpack.c.bf16 %v1322_v19, %v1319_v18 }
 0x2a8   :  { %2278 = vst [vmem:[%s3323_s7 + $0x18] sm:$0xff] %v2134_v20  }
 0x2a9   :  { %2277 = vst [vmem:[%s3323_s7 + $0x10] sm:$0xff] %v2129_v21   ;;  %v2565_v22 = vpop.f32.mrb[40].mxu0 }
 0x2aa   :  { %v1334_v23 = vpop.f32.mrb[41].mxu0  ;;  %v1343_v25 = vadd.f32 %v2565_v22, %v3154_v61 }
 0x2ab   :  { %v2566_v24 = vpop.f32.mrb[42].mxu0  ;;  %v1335_v28 = vadd.f32 %v3154_v61, %v1334_v23 }
 0x2ac   :  { %v1346_v26 = vadd.f32 %v2566_v24, %v3154_v61  ;;  %v1337_v27 = vpop.f32.mrb[43].mxu0 }
 0x2ad   :  { %v1338_v29 = vadd.f32 %v3154_v61, %v1337_v27 }
 0x2ae   :  { %v2144_v15 = vpack.c.bf16 %v1346_v26, %v1343_v25 }
 0x2af   :  { %v2139_v17 = vpack.c.bf16 %v1338_v29, %v1335_v28 }
 0x2b0   :  { %2280 = vst [vmem:[%s3323_s7 + $0x28] sm:$0xff] %v2144_v15  }
 0x2b1   :  { %2279 = vst [vmem:[%s3323_s7 + $0x20] sm:$0xff] %v2139_v17   ;;  %v2569_v44 = vpop.f32.mrb[44].mxu0 }
 0x2b2   :  { %v1350_v46 = vpop.f32.mrb[45].mxu0  ;;  %v1359_v10 = vadd.f32 %v2569_v44, %v3154_v61 }
 0x2b3   :  { %v2570_v8 = vpop.f32.mrb[46].mxu0  ;;  %v1351_v5 = vadd.f32 %v3154_v61, %v1350_v46 }
 0x2b4   :  { %v1362_v39 = vadd.f32 %v2570_v8, %v3154_v61  ;;  %v1353_v41 = vpop.f32.mrb[47].mxu0 }
 0x2b5   :  { %v1354_v7 = vadd.f32 %v3154_v61, %v1353_v41 }
 0x2b6   :  { %v2154_v30 = vpack.c.bf16 %v1362_v39, %v1359_v10 }
 0x2b7   :  { %v2149_v31 = vpack.c.bf16 %v1354_v7, %v1351_v5 }
 0x2b8   :  { %2282 = vst [vmem:[%s3323_s7 + $0x38] sm:$0xff] %v2154_v30  }
 0x2b9   :  { %2281 = vst [vmem:[%s3323_s7 + $0x30] sm:$0xff] %v2149_v31   ;;  %v2573_v32 = vpop.f32.mrb[48].mxu0 }
 0x2ba   :  { %v1366_v33 = vpop.f32.mrb[49].mxu0  ;;  %v1375_v35 = vadd.f32 %v2573_v32, %v3154_v61 }
 0x2bb   :  { %v2574_v34 = vpop.f32.mrb[50].mxu0  ;;  %v1367_v40 = vadd.f32 %v3154_v61, %v1366_v33 }
 0x2bc   :  { %v1378_v36 = vadd.f32 %v2574_v34, %v3154_v61  ;;  %v1369_v37 = vpop.f32.mrb[51].mxu0 }
 0x2bd   :  { %v1370_v42 = vadd.f32 %v3154_v61, %v1369_v37 }
 0x2be   :  { %v2164_v43 = vpack.c.bf16 %v1378_v36, %v1375_v35 }
 0x2bf   :  { %v2159_v45 = vpack.c.bf16 %v1370_v42, %v1367_v40 }
 0x2c0   :  { %2284 = vst [vmem:[%s3323_s7 + $0x48] sm:$0xff] %v2164_v43  }
 0x2c1   :  { %2283 = vst [vmem:[%s3323_s7 + $0x40] sm:$0xff] %v2159_v45   ;;  %v2577_v47 = vpop.f32.mrb[52].mxu0 }
 0x2c2   :  { %v1382_v48 = vpop.f32.mrb[53].mxu0  ;;  %v1391_v50 = vadd.f32 %v2577_v47, %v3154_v61 }
 0x2c3   :  { %v2578_v49 = vpop.f32.mrb[54].mxu0  ;;  %v1383_v53 = vadd.f32 %v3154_v61, %v1382_v48 }
 0x2c4   :  { %v1394_v51 = vadd.f32 %v2578_v49, %v3154_v61  ;;  %v1385_v52 = vpop.f32.mrb[55].mxu0 }
 0x2c5   :  { %v1386_v54 = vadd.f32 %v3154_v61, %v1385_v52 }
 0x2c6   :  { %v2174_v55 = vpack.c.bf16 %v1394_v51, %v1391_v50 }
 0x2c7   :  { %v2169_v56 = vpack.c.bf16 %v1386_v54, %v1383_v53 }
 0x2c8   :  { %2286 = vst [vmem:[%s3323_s7 + $0x58] sm:$0xff] %v2174_v55  }
 0x2c9   :  { %2285 = vst [vmem:[%s3323_s7 + $0x50] sm:$0xff] %v2169_v56   ;;  %v2581_v57 = vpop.f32.mrb[56].mxu0 }
 0x2ca   :  { %v1398_v58 = vpop.f32.mrb[57].mxu0  ;;  %v1407_v60 = vadd.f32 %v2581_v57, %v3154_v61 }
 0x2cb   :  { %v2582_v59 = vpop.f32.mrb[58].mxu0  ;;  %v1399_v38 = vadd.f32 %v3154_v61, %v1398_v58 }
 0x2cc   :  { %v1410_v62 = vadd.f32 %v2582_v59, %v3154_v61  ;;  %v1401_v63 = vpop.f32.mrb[59].mxu0 }
 0x2cd   :  { %v1402_v0 = vadd.f32 %v3154_v61, %v1401_v63 }
 0x2ce   :  { %v2184_v1 = vpack.c.bf16 %v1410_v62, %v1407_v60 }
 0x2cf   :  { %v2179_v2 = vpack.c.bf16 %v1402_v0, %v1399_v38 }
 0x2d0   :  { %2288 = vst [vmem:[%s3323_s7 + $0x68] sm:$0xff] %v2184_v1  }
 0x2d1   :  { %2287 = vst [vmem:[%s3323_s7 + $0x60] sm:$0xff] %v2179_v2   ;;  %v2585_v3 = vpop.f32.mrb[60].mxu0 }
 0x2d2   :  { %v1414_v4 = vpop.f32.mrb[61].mxu0  ;;  %v1423_v9 = vadd.f32 %v2585_v3, %v3154_v61 }
 0x2d3   :  { %v2586_v6 = vpop.f32.mrb[62].mxu0  ;;  %v1415_v13 = vadd.f32 %v3154_v61, %v1414_v4 }
 0x2d4   :  { %v1426_v11 = vadd.f32 %v2586_v6, %v3154_v61  ;;  %v1417_v12 = vpop.f32.mrb[63].mxu0 }
 0x2d5   :  { %v1418_v14 = vadd.f32 %v3154_v61, %v1417_v12 }
 0x2d6   :  { %v2194_v16 = vpack.c.bf16 %v1426_v11, %v1423_v9 }
 0x2d7   :  { %v2189_v18 = vpack.c.bf16 %v1418_v14, %v1415_v13 }
 0x2d8   :  { %2290 = vst [vmem:[%s3323_s7 + $0x78] sm:$0xff] %v2194_v16  }
 0x2d9   :  { %2289 = vst [vmem:[%s3323_s7 + $0x70] sm:$0xff] %v2189_v18   ;;  %v2589_v19 = vpop.f32.mrb[64].mxu0 }
 0x2da   :  { %v1430_v20 = vpop.f32.mrb[65].mxu0  ;;  %v1439_v22 = vadd.f32 %v2589_v19, %v3154_v61 }
 0x2db   :  { %v2590_v21 = vpop.f32.mrb[66].mxu0  ;;  %v1431_v25 = vadd.f32 %v3154_v61, %v1430_v20 }
 0x2dc   :  { %v1442_v23 = vadd.f32 %v2590_v21, %v3154_v61  ;;  %v1433_v24 = vpop.f32.mrb[67].mxu0 }
 0x2dd   :  { %v1434_v26 = vadd.f32 %v3154_v61, %v1433_v24 }
 0x2de   :  { %v2204_v27 = vpack.c.bf16 %v1442_v23, %v1439_v22 }
 0x2df   :  { %v2199_v28 = vpack.c.bf16 %v1434_v26, %v1431_v25 }
 0x2e0   :  { %2292 = vst [vmem:[%s3323_s7 + $0x88] sm:$0xff] %v2204_v27  }
 0x2e1   :  { %2291 = vst [vmem:[%s3323_s7 + $0x80] sm:$0xff] %v2199_v28   ;;  %v2593_v29 = vpop.f32.mrb[68].mxu0 }
 0x2e2   :  { %v1446_v15 = vpop.f32.mrb[69].mxu0  ;;  %v1455_v44 = vadd.f32 %v2593_v29, %v3154_v61 }
 0x2e3   :  { %v2594_v17 = vpop.f32.mrb[70].mxu0  ;;  %v1447_v10 = vadd.f32 %v3154_v61, %v1446_v15 }
 0x2e4   :  { %v1458_v46 = vadd.f32 %v2594_v17, %v3154_v61  ;;  %v1449_v8 = vpop.f32.mrb[71].mxu0 }
 0x2e5   :  { %v1450_v39 = vadd.f32 %v3154_v61, %v1449_v8 }
 0x2e6   :  { %v2214_v41 = vpack.c.bf16 %v1458_v46, %v1455_v44 }
 0x2e7   :  { %v2209_v5 = vpack.c.bf16 %v1450_v39, %v1447_v10 }
 0x2e8   :  { %2294 = vst [vmem:[%s3323_s7 + $0x98] sm:$0xff] %v2214_v41  }
 0x2e9   :  { %2293 = vst [vmem:[%s3323_s7 + $0x90] sm:$0xff] %v2209_v5   ;;  %v2597_v7 = vpop.f32.mrb[72].mxu0 }
 0x2ea   :  { %v1462_v30 = vpop.f32.mrb[73].mxu0  ;;  %v1471_v32 = vadd.f32 %v2597_v7, %v3154_v61 }
 0x2eb   :  { %v2598_v31 = vpop.f32.mrb[74].mxu0  ;;  %v1463_v35 = vadd.f32 %v3154_v61, %v1462_v30 }
 0x2ec   :  { %v1474_v33 = vadd.f32 %v2598_v31, %v3154_v61  ;;  %v1465_v34 = vpop.f32.mrb[75].mxu0 }
 0x2ed   :  { %v1466_v36 = vadd.f32 %v3154_v61, %v1465_v34 }
 0x2ee   :  { %v2224_v37 = vpack.c.bf16 %v1474_v33, %v1471_v32 }
 0x2ef   :  { %v2219_v40 = vpack.c.bf16 %v1466_v36, %v1463_v35 }
 0x2f0   :  { %2296 = vst [vmem:[%s3323_s7 + $0xa8] sm:$0xff] %v2224_v37  }
 0x2f1   :  { %2295 = vst [vmem:[%s3323_s7 + $0xa0] sm:$0xff] %v2219_v40   ;;  %v2601_v42 = vpop.f32.mrb[76].mxu0 }
 0x2f2   :  { %v1478_v43 = vpop.f32.mrb[77].mxu0  ;;  %v1487_v47 = vadd.f32 %v2601_v42, %v3154_v61 }
 0x2f3   :  { %v2602_v45 = vpop.f32.mrb[78].mxu0  ;;  %v1479_v50 = vadd.f32 %v3154_v61, %v1478_v43 }
 0x2f4   :  { %v1490_v48 = vadd.f32 %v2602_v45, %v3154_v61  ;;  %v1481_v49 = vpop.f32.mrb[79].mxu0 }
 0x2f5   :  { %v1482_v51 = vadd.f32 %v3154_v61, %v1481_v49 }
 0x2f6   :  { %v2234_v52 = vpack.c.bf16 %v1490_v48, %v1487_v47 }
 0x2f7   :  { %v2229_v53 = vpack.c.bf16 %v1482_v51, %v1479_v50 }
 0x2f8   :  { %2298 = vst [vmem:[%s3323_s7 + $0xb8] sm:$0xff] %v2234_v52  }
 0x2f9   :  { %2297 = vst [vmem:[%s3323_s7 + $0xb0] sm:$0xff] %v2229_v53   ;;  %v2605_v54 = vpop.f32.mrb[80].mxu0 }
 0x2fa   :  { %v1494_v55 = vpop.f32.mrb[81].mxu0  ;;  %v1503_v57 = vadd.f32 %v2605_v54, %v3154_v61 }
 0x2fb   :  { %v2606_v56 = vpop.f32.mrb[82].mxu0  ;;  %v1495_v60 = vadd.f32 %v3154_v61, %v1494_v55 }
 0x2fc   :  { %v1506_v58 = vadd.f32 %v2606_v56, %v3154_v61  ;;  %v1497_v59 = vpop.f32.mrb[83].mxu0 }
 0x2fd   :  { %v1498_v62 = vadd.f32 %v3154_v61, %v1497_v59 }
 0x2fe   :  { %v2244_v63 = vpack.c.bf16 %v1506_v58, %v1503_v57 }
 0x2ff   :  { %v2239_v38 = vpack.c.bf16 %v1498_v62, %v1495_v60 }
 0x300   :  { %2300 = vst [vmem:[%s3323_s7 + $0xc8] sm:$0xff] %v2244_v63  }
 0x301   :  { %2299 = vst [vmem:[%s3323_s7 + $0xc0] sm:$0xff] %v2239_v38   ;;  %v2609_v0 = vpop.f32.mrb[84].mxu0 }
 0x302   :  { %v1510_v1 = vpop.f32.mrb[85].mxu0  ;;  %v1519_v3 = vadd.f32 %v2609_v0, %v3154_v61 }
 0x303   :  { %v2610_v2 = vpop.f32.mrb[86].mxu0  ;;  %v1511_v9 = vadd.f32 %v3154_v61, %v1510_v1 }
 0x304   :  { %v1522_v4 = vadd.f32 %v2610_v2, %v3154_v61  ;;  %v1513_v6 = vpop.f32.mrb[87].mxu0 }
 0x305   :  { %v1514_v11 = vadd.f32 %v3154_v61, %v1513_v6 }
 0x306   :  { %v2254_v12 = vpack.c.bf16 %v1522_v4, %v1519_v3 }
 0x307   :  { %v2249_v13 = vpack.c.bf16 %v1514_v11, %v1511_v9 }
 0x308   :  { %2302 = vst [vmem:[%s3323_s7 + $0xd8] sm:$0xff] %v2254_v12  }
 0x309   :  { %2301 = vst [vmem:[%s3323_s7 + $0xd0] sm:$0xff] %v2249_v13   ;;  %v2613_v14 = vpop.f32.mrb[88].mxu0 }
 0x30a   :  { %v1526_v16 = vpop.f32.mrb[89].mxu0  ;;  %v1535_v19 = vadd.f32 %v2613_v14, %v3154_v61 }
 0x30b   :  { %v2614_v18 = vpop.f32.mrb[90].mxu0  ;;  %v1527_v22 = vadd.f32 %v3154_v61, %v1526_v16 }
 0x30c   :  { %v1538_v20 = vadd.f32 %v2614_v18, %v3154_v61  ;;  %v1529_v21 = vpop.f32.mrb[91].mxu0 }
 0x30d   :  { %v1530_v23 = vadd.f32 %v3154_v61, %v1529_v21 }
 0x30e   :  { %v2264_v24 = vpack.c.bf16 %v1538_v20, %v1535_v19 }
 0x30f   :  { %v2259_v25 = vpack.c.bf16 %v1530_v23, %v1527_v22 }
 0x310   :  { %2304 = vst [vmem:[%s3323_s7 + $0xe8] sm:$0xff] %v2264_v24  }
 0x311   :  { %2303 = vst [vmem:[%s3323_s7 + $0xe0] sm:$0xff] %v2259_v25   ;;  %v2617_v26 = vpop.f32.mrb[92].mxu0 }
 0x312   :  { %v1542_v27 = vpop.f32.mrb[93].mxu0  ;;  %v1551_v29 = vadd.f32 %v2617_v26, %v3154_v61 }
 0x313   :  { %v2618_v28 = vpop.f32.mrb[94].mxu0  ;;  %v1543_v44 = vadd.f32 %v3154_v61, %v1542_v27 }
 0x314   :  { %v1554_v15 = vadd.f32 %v2618_v28, %v3154_v61  ;;  %v1545_v17 = vpop.f32.mrb[95].mxu0 }
 0x315   :  { %v1546_v46 = vadd.f32 %v3154_v61, %v1545_v17 }
 0x316   :  { %v2274_v8 = vpack.c.bf16 %v1554_v15, %v1551_v29 }
 0x317   :  { %v2269_v10 = vpack.c.bf16 %v1546_v46, %v1543_v44 }
 0x318   :  { %2306 = vst [vmem:[%s3323_s7 + $0xf8] sm:$0xff] %v2274_v8  }
 0x319   :  { %2305 = vst [vmem:[%s3323_s7 + $0xf0] sm:$0xff] %v2269_v10  }

</bundles_post_ra>
